<compile_context>
chip_gen: v6e
topology: v6e:2x2x1
jax: 0.10.0
libtpu: 0.0.40
codegen_flags: <defaults>
</compile_context>

<pallas_src>
import jax
import jax.numpy as jnp
from jax.experimental import pallas as pl
from jax.experimental.pallas import tpu as pltpu


def make_net_kernel(layer_num, residual_layer, neuron_num, d_in, d_out,
                    use_vpu_first, use_vpu_last):
    res_save, res_add = residual_layer

    def kernel(act_a_ref, x_ref, *rest):
        # rest = (Wt0, b0, Wt1, b1, ..., Wt_{L-1}, b_{L-1}, out_ref)
        wb_refs = rest[:-1]
        out_ref = rest[-1]

        # Activations in transposed layout: [features, tile_n] (batch on lanes).
        h = x_ref[...].astype(jnp.float32)          # [d_in, tile_n]
        tile_n = h.shape[1]

        temp = None
        temp_slim = False

        def add_residual(h, temp, temp_slim):
            if temp_slim:
                # temp is the slim [d_in, tile_n] layer-0 input; pad it only
                # transiently at the add point (keeps its live vreg footprint
                # ~1 vreg across the intervening layers).
                pad = jnp.zeros((neuron_num - d_in, tile_n), jnp.float32)
                return h + jnp.concatenate([temp, pad], axis=0)
            return h + temp

        for i in range(layer_num - 1):
            if i in res_add:
                h = add_residual(h, temp, temp_slim)
            if i in res_save:
                temp = h                             # slim at i==0 (raw input)
                temp_slim = (i == 0 and d_in != neuron_num)

            wt = wb_refs[2 * i][...]                 # [out_feat, in_feat]
            b = wb_refs[2 * i + 1][...]              # [out_feat, 1] -> lane broadcast
            if i == 0 and use_vpu_first:
                # K = d_in is tiny: VPU outer-product instead of an MXU round-trip.
                z = b
                for k in range(d_in):
                    z = z + wt[:, k:k + 1] * h[k:k + 1, :]
            else:
                z = jnp.dot(wt, h, preferred_element_type=jnp.float32) + b

            a = act_a_ref[i]                         # scalar act param (1-D SMEM)
            h = jnp.tanh(a * z)                      # adaptive-tanh activation

        if (layer_num - 1) in res_add:
            h = add_residual(h, temp, temp_slim)

        wl = wb_refs[2 * (layer_num - 1)][...]
        bl = wb_refs[2 * (layer_num - 1) + 1][...]   # [d_out, 1]
        if use_vpu_last:
            # wl is [neuron_num, 1]: broadcast multiply + sublane (XLU) reduce.
            out = jnp.sum(wl * h, axis=0, keepdims=True) + bl       # [1, tile_n]
        else:
            out = jnp.dot(wl, h, preferred_element_type=jnp.float32) + bl
        out_ref[...] = out.astype(out_ref.dtype)

    return kernel


def net_forward(x, params, act_a, *, layer_num, residual_layer, neuron_num,
                io_dim, tile_n=512, feature_major=False):
    """Forward pass of NET.

    x: [N, d_in] (feature_major=False) or [d_in, N] (feature_major=True).
    Returns [N, d_out].  Feature-major input avoids an extra HBM transpose
    pass over x, which matters at PINN-scale collocation batches.
    """
    d_in, d_out = io_dim

    if feature_major:
        assert x.shape[0] == d_in
        x_t = x                                     # [d_in, N], no extra HBM pass
    else:
        assert x.shape[1] == d_in
        # TODO(synk): for PINN-scale batches, supply feature-major input instead
        # of paying this extra HBM read+write pass over x.
        x_t = x.T
    N = x_t.shape[1]

    # Tile selection: whole (padded) batch in one step when small; otherwise
    # tiles of tile_n (keep multiples of 256 for v6e/v7x MXU; 128 suffices on
    # v5e).  tile_n=512 keeps h+z at ~32 live vregs (no f32 spills).
    if N <= tile_n:
        tile_n = max(128, -(-N // 128) * 128)
    n_pad = -(-N // tile_n) * tile_n
    if n_pad != N:
        x_t = jnp.pad(x_t, ((0, 0), (0, n_pad - N)))

    use_vpu_first = d_in <= 8      # degenerate K -> VPU FMAs
    use_vpu_last = (d_out == 1)    # degenerate N -> VPU mul + sublane reduce

    kernel = make_net_kernel(layer_num, residual_layer, neuron_num, d_in, d_out,
                             use_vpu_first, use_vpu_last)

    # Activation params: flat 1-D SMEM buffer (2-D SMEM pads to an (8,128)
    # word slab).  The synthetic activation only uses act_param[i, 0].
    act_flat = jnp.asarray(act_a, jnp.float32).reshape(layer_num - 1, -1)[:, 0]

    # Flat weight/bias argument list + BlockSpecs (full-array blocks, resident
    # across the batch grid).  Weights are passed pre-transposed so the kernel
    # computes z = W^T @ h directly.
    wb_args, wb_specs = [], []
    n_weight_elems = 0
    for li, (w, b) in enumerate(params):
        last = (li == layer_num - 1)
        if last and use_vpu_last:
            wk = w.reshape(neuron_num, 1)           # column form for VPU path
        else:
            wk = w.T                                # [out_feat, in_feat]
        bk = b.reshape(-1, 1)                       # [out_feat, 1]
        n_weight_elems += wk.size + bk.size
        wb_args += [wk, bk]
        wb_specs += [
            pl.BlockSpec(wk.shape, lambda i: (0, 0)),
            pl.BlockSpec(bk.shape, lambda i: (0, 0)),
        ]

    in_specs = (
        [pl.BlockSpec(memory_space=pltpu.MemorySpace.SMEM)]        # act params
        + [pl.BlockSpec((d_in, tile_n), lambda i: (0, i))]         # x tile (feature-major)
        + wb_specs
    )
    # Lane-dense output slab; d_out must equal the full output feature dim.
    out_spec = pl.BlockSpec((d_out, tile_n), lambda i: (0, i))

    # Advisory cost estimate so XLA schedules this tiny call well against the
    # surrounding PINN loss pipeline.
    H = neuron_num
    flops = 2 * n_pad * (d_in * H + (layer_num - 2) * H * H + H * d_out)
    transcendentals = (layer_num - 1) * H * n_pad
    bytes_accessed = 4 * (n_pad * d_in + n_pad * d_out + n_weight_elems)
    cost = pl.CostEstimate(flops=flops, transcendentals=transcendentals,
                           bytes_accessed=bytes_accessed)

    out_t = pl.pallas_call(
        kernel,
        out_shape=jax.ShapeDtypeStruct((d_out, n_pad), jnp.float32),
        grid=(n_pad // tile_n,),
        in_specs=in_specs,
        out_specs=out_spec,
        compiler_params=pltpu.CompilerParams(
            dimension_semantics=("parallel",)),
        cost_estimate=cost,
    )(act_flat, x_t, *wb_args)

    # [d_out, N] -> [N, d_out] is a free relayout for d_out == 1.
    return out_t[:, :N].T


def net_ref(x, params, act_a, *, layer_num, residual_layer, neuron_num, io_dim):
    """Pure-JAX reference of the PyTorch forward pass (natural layout)."""
    res_save, res_add = residual_layer
    temp = None
    for i in range(layer_num - 1):
        if i in res_add:
            x = x + temp
        if i in res_save:
            if i == 0:
                pad = jnp.zeros((x.shape[0], neuron_num - io_dim[0]), x.dtype)
                temp = jnp.concatenate((x, pad), axis=1)
            else:
                temp = x
        w, b = params[i]
        x = jnp.tanh(act_a[i, 0] * (x @ w + b))
    if (layer_num - 1) in res_add:
        x = x + temp
    w, b = params[-1]
    return x @ w + b


if __name__ == "__main__":
    # Config (matches the module's __init__)
    io_dim = (2, 1)
    layer_num = 4
    residual_layer = ([0, 2], [2])
    neuron_num = 32
    actpara_num = 1

    N = 4096          # 8 grid steps at tile_n=512 -> 4 steps per v7x TensorCore
    tile_n = 512
    key = jax.random.PRNGKey(0)

    # Layer dims: [d_in, H, H, H, d_out]; weights stored as [in, out] so y = x @ W + b
    dims = [io_dim[0]] + [neuron_num] * (layer_num - 1) + [io_dim[1]]

    params = []
    for li in range(layer_num):
        key, kw, kb = jax.random.split(key, 3)
        fan_in = dims[li]
        w = jax.random.uniform(kw, (dims[li], dims[li + 1]), jnp.float32,
                               minval=-1.0, maxval=1.0) / jnp.sqrt(fan_in)
        b = jax.random.uniform(kb, (dims[li + 1],), jnp.float32,
                               minval=-0.1, maxval=0.1)
        params.append((w, b))

    # act_param initialized to ones, as in the module's __init__
    act_a = jnp.ones((layer_num - 1, actpara_num), jnp.float32)

    key, kx = jax.random.split(key)
    # Feature-major collocation points [d_in, N] -> no x-transpose HBM pass anywhere.
    x_fm = jax.random.uniform(kx, (io_dim[0], N), jnp.float32,
                              minval=-1.0, maxval=1.0)

    out = net_forward(x_fm, params, act_a,
                      layer_num=layer_num, residual_layer=residual_layer,
                      neuron_num=neuron_num, io_dim=io_dim,
                      tile_n=tile_n, feature_major=True)
    out = jax.block_until_ready(out)

    ref = net_ref(x_fm.T, params, act_a,
                  layer_num=layer_num, residual_layer=residual_layer,
                  neuron_num=neuron_num, io_dim=io_dim)
    assert out.shape == (N, io_dim[1])
    assert jnp.allclose(out, ref, atol=1e-5, rtol=1e-5), "mismatch vs reference"

    print("KERNEL_OK")
</pallas_src>

<mosaic_0001>
module attributes {stable_mosaic.version = 11 : i64} {
  func.func @kernel(%arg0: i32, %arg1: memref<3xf32, #tpu.memory_space<smem>>, %arg2: memref<2x512xf32, #tpu.memory_space<vmem>>, %arg3: memref<32x2xf32, #tpu.memory_space<vmem>>, %arg4: memref<32x1xf32, #tpu.memory_space<vmem>>, %arg5: memref<32x32xf32, #tpu.memory_space<vmem>>, %arg6: memref<32x1xf32, #tpu.memory_space<vmem>>, %arg7: memref<32x32xf32, #tpu.memory_space<vmem>>, %arg8: memref<32x1xf32, #tpu.memory_space<vmem>>, %arg9: memref<32x1xf32, #tpu.memory_space<vmem>>, %arg10: memref<1x1xf32, #tpu.memory_space<vmem>>, %arg11: memref<1x512xf32, #tpu.memory_space<vmem>>) attributes {dimension_semantics = [#tpu.dimension_semantics<parallel>], iteration_bounds = array<i64: 8>, scalar_prefetch = 0 : i64, scratch_operands = 0 : i64, tpu.core_type = #tpu.core_type<tc>, window_params = [{transform_indices = @transform_0, window_bounds = array<i64: 3>}, {transform_indices = @transform_1, window_bounds = array<i64: 2, 512>}, {pipeline_mode = #tpu.pipeline_mode<synchronous>, transform_indices = @transform_2, window_bounds = array<i64: 32, 2>}, {pipeline_mode = #tpu.pipeline_mode<synchronous>, transform_indices = @transform_3, window_bounds = array<i64: 32, 1>}, {pipeline_mode = #tpu.pipeline_mode<synchronous>, transform_indices = @transform_4, window_bounds = array<i64: 32, 32>}, {pipeline_mode = #tpu.pipeline_mode<synchronous>, transform_indices = @transform_5, window_bounds = array<i64: 32, 1>}, {pipeline_mode = #tpu.pipeline_mode<synchronous>, transform_indices = @transform_6, window_bounds = array<i64: 32, 32>}, {pipeline_mode = #tpu.pipeline_mode<synchronous>, transform_indices = @transform_7, window_bounds = array<i64: 32, 1>}, {pipeline_mode = #tpu.pipeline_mode<synchronous>, transform_indices = @transform_8, window_bounds = array<i64: 32, 1>}, {pipeline_mode = #tpu.pipeline_mode<synchronous>, transform_indices = @transform_9, window_bounds = array<i64: 1, 1>}, {transform_indices = @transform_10, window_bounds = array<i64: 1, 512>}]} {
    %c0 = arith.constant 0 : index
    %c0_0 = arith.constant 0 : index
    %0 = vector.load %arg2[%c0, %c0_0] : memref<2x512xf32, #tpu.memory_space<vmem>>, vector<2x512xf32>
    %c0_1 = arith.constant 0 : index
    %c0_2 = arith.constant 0 : index
    %1 = vector.load %arg3[%c0_1, %c0_2] : memref<32x2xf32, #tpu.memory_space<vmem>>, vector<32x2xf32>
    %c0_3 = arith.constant 0 : index
    %c0_4 = arith.constant 0 : index
    %2 = vector.load %arg4[%c0_3, %c0_4] : memref<32x1xf32, #tpu.memory_space<vmem>>, vector<32x1xf32>
    %3 = vector.extract_strided_slice %1 {offsets = [0, 0], sizes = [32, 1], strides = [1, 1]} : vector<32x2xf32> to vector<32x1xf32>
    %4 = vector.extract_strided_slice %0 {offsets = [0, 0], sizes = [1, 512], strides = [1, 1]} : vector<2x512xf32> to vector<1x512xf32>
    %5 = vector.broadcast %3 : vector<32x1xf32> to vector<32x512xf32>
    %6 = vector.broadcast %4 : vector<1x512xf32> to vector<32x512xf32>
    %7 = arith.mulf %5, %6 : vector<32x512xf32>
    %8 = vector.broadcast %2 : vector<32x1xf32> to vector<32x512xf32>
    %9 = arith.addf %8, %7 : vector<32x512xf32>
    %10 = vector.extract_strided_slice %1 {offsets = [0, 1], sizes = [32, 1], strides = [1, 1]} : vector<32x2xf32> to vector<32x1xf32>
    %11 = vector.extract_strided_slice %0 {offsets = [1, 0], sizes = [1, 512], strides = [1, 1]} : vector<2x512xf32> to vector<1x512xf32>
    %12 = vector.broadcast %10 : vector<32x1xf32> to vector<32x512xf32>
    %13 = vector.broadcast %11 : vector<1x512xf32> to vector<32x512xf32>
    %14 = arith.mulf %12, %13 : vector<32x512xf32>
    %15 = arith.addf %9, %14 : vector<32x512xf32>
    %c0_5 = arith.constant 0 : index
    %16 = memref.load %arg1[%c0_5] : memref<3xf32, #tpu.memory_space<smem>>
    %17 = vector.broadcast %16 : f32 to vector<32x512xf32>
    %18 = arith.mulf %17, %15 : vector<32x512xf32>
    %19 = math.tanh %18 : vector<32x512xf32>
    %c0_6 = arith.constant 0 : index
    %c0_7 = arith.constant 0 : index
    %20 = vector.load %arg5[%c0_6, %c0_7] : memref<32x32xf32, #tpu.memory_space<vmem>>, vector<32x32xf32>
    %c0_8 = arith.constant 0 : index
    %c0_9 = arith.constant 0 : index
    %21 = vector.load %arg6[%c0_8, %c0_9] : memref<32x1xf32, #tpu.memory_space<vmem>>, vector<32x1xf32>
    %cst = arith.constant dense<0.000000e+00> : vector<32x512xf32>
    %22 = tpu.matmul %20, %19, %cst {dimension_numbers = #tpu.dot_dimension_numbers<[1], [0], [0], [1], [0, 0, 1, 1], [], []>} : vector<32x32xf32>, vector<32x512xf32>, vector<32x512xf32> -> vector<32x512xf32>
    %23 = vector.broadcast %21 : vector<32x1xf32> to vector<32x512xf32>
    %24 = arith.addf %22, %23 : vector<32x512xf32>
    %c1 = arith.constant 1 : index
    %25 = memref.load %arg1[%c1] : memref<3xf32, #tpu.memory_space<smem>>
    %26 = vector.broadcast %25 : f32 to vector<32x512xf32>
    %27 = arith.mulf %26, %24 : vector<32x512xf32>
    %28 = math.tanh %27 : vector<32x512xf32>
    %cst_10 = arith.constant 0.000000e+00 : f32
    %29 = vector.broadcast %cst_10 : f32 to vector<30x512xf32>
    %30 = tpu.concatenate %0, %29 in 0 : vector<2x512xf32>, vector<30x512xf32> -> vector<32x512xf32>
    %31 = arith.addf %28, %30 : vector<32x512xf32>
    %c0_11 = arith.constant 0 : index
    %c0_12 = arith.constant 0 : index
    %32 = vector.load %arg7[%c0_11, %c0_12] : memref<32x32xf32, #tpu.memory_space<vmem>>, vector<32x32xf32>
    %c0_13 = arith.constant 0 : index
    %c0_14 = arith.constant 0 : index
    %33 = vector.load %arg8[%c0_13, %c0_14] : memref<32x1xf32, #tpu.memory_space<vmem>>, vector<32x1xf32>
    %cst_15 = arith.constant dense<0.000000e+00> : vector<32x512xf32>
    %34 = tpu.matmul %32, %31, %cst_15 {dimension_numbers = #tpu.dot_dimension_numbers<[1], [0], [0], [1], [0, 0, 1, 1], [], []>} : vector<32x32xf32>, vector<32x512xf32>, vector<32x512xf32> -> vector<32x512xf32>
    %35 = vector.broadcast %33 : vector<32x1xf32> to vector<32x512xf32>
    %36 = arith.addf %34, %35 : vector<32x512xf32>
    %c2 = arith.constant 2 : index
    %37 = memref.load %arg1[%c2] : memref<3xf32, #tpu.memory_space<smem>>
    %38 = vector.broadcast %37 : f32 to vector<32x512xf32>
    %39 = arith.mulf %38, %36 : vector<32x512xf32>
    %40 = math.tanh %39 : vector<32x512xf32>
    %c0_16 = arith.constant 0 : index
    %c0_17 = arith.constant 0 : index
    %41 = vector.load %arg9[%c0_16, %c0_17] : memref<32x1xf32, #tpu.memory_space<vmem>>, vector<32x1xf32>
    %c0_18 = arith.constant 0 : index
    %c0_19 = arith.constant 0 : index
    %42 = vector.load %arg10[%c0_18, %c0_19] : memref<1x1xf32, #tpu.memory_space<vmem>>, vector<1x1xf32>
    %43 = vector.broadcast %41 : vector<32x1xf32> to vector<32x512xf32>
    %44 = arith.mulf %43, %40 : vector<32x512xf32>
    %cst_20 = arith.constant dense<0.000000e+00> : vector<512xf32>
    %45 = vector.multi_reduction <add>, %44, %cst_20 [0] : vector<32x512xf32> to vector<512xf32>
    %46 = vector.shape_cast %45 : vector<512xf32> to vector<1x512xf32>
    %47 = vector.broadcast %42 : vector<1x1xf32> to vector<1x512xf32>
    %48 = arith.addf %46, %47 : vector<1x512xf32>
    %c0_21 = arith.constant 0 : index
    %c0_22 = arith.constant 0 : index
    %49 = vector.load %arg11[%c0_21, %c0_22] : memref<1x512xf32, #tpu.memory_space<vmem>>, vector<1x512xf32>
    tpu.vector_store %arg11[%c0_21, %c0_22], %48 {strides = array<i32>} : memref<1x512xf32, #tpu.memory_space<vmem>>, vector<1x512xf32>,
    return
  }
  func.func @transform_0(%arg0: i32) -> i32 {
    %c0_i32 = arith.constant 0 : i32
    %c0_i32_0 = arith.constant 0 : i32
    return %c0_i32 : i32
  }
  func.func @transform_1(%arg0: i32) -> (i32, i32) {
    %c0_i32 = arith.constant 0 : i32
    %c0_i32_0 = arith.constant 0 : i32
    return %c0_i32, %arg0 : i32, i32
  }
  func.func @transform_2(%arg0: i32) -> (i32, i32) {
    %c0_i32 = arith.constant 0 : i32
    %c0_i32_0 = arith.constant 0 : i32
    %c0_i32_1 = arith.constant 0 : i32
    return %c0_i32, %c0_i32_0 : i32, i32
  }
  func.func @transform_3(%arg0: i32) -> (i32, i32) {
    %c0_i32 = arith.constant 0 : i32
    %c0_i32_0 = arith.constant 0 : i32
    %c0_i32_1 = arith.constant 0 : i32
    return %c0_i32, %c0_i32_0 : i32, i32
  }
  func.func @transform_4(%arg0: i32) -> (i32, i32) {
    %c0_i32 = arith.constant 0 : i32
    %c0_i32_0 = arith.constant 0 : i32
    %c0_i32_1 = arith.constant 0 : i32
    return %c0_i32, %c0_i32_0 : i32, i32
  }
  func.func @transform_5(%arg0: i32) -> (i32, i32) {
    %c0_i32 = arith.constant 0 : i32
    %c0_i32_0 = arith.constant 0 : i32
    %c0_i32_1 = arith.constant 0 : i32
    return %c0_i32, %c0_i32_0 : i32, i32
  }
  func.func @transform_6(%arg0: i32) -> (i32, i32) {
    %c0_i32 = arith.constant 0 : i32
    %c0_i32_0 = arith.constant 0 : i32
    %c0_i32_1 = arith.constant 0 : i32
    return %c0_i32, %c0_i32_0 : i32, i32
  }
  func.func @transform_7(%arg0: i32) -> (i32, i32) {
    %c0_i32 = arith.constant 0 : i32
    %c0_i32_0 = arith.constant 0 : i32
    %c0_i32_1 = arith.constant 0 : i32
    return %c0_i32, %c0_i32_0 : i32, i32
  }
  func.func @transform_8(%arg0: i32) -> (i32, i32) {
    %c0_i32 = arith.constant 0 : i32
    %c0_i32_0 = arith.constant 0 : i32
    %c0_i32_1 = arith.constant 0 : i32
    return %c0_i32, %c0_i32_0 : i32, i32
  }
  func.func @transform_9(%arg0: i32) -> (i32, i32) {
    %c0_i32 = arith.constant 0 : i32
    %c0_i32_0 = arith.constant 0 : i32
    %c0_i32_1 = arith.constant 0 : i32
    return %c0_i32, %c0_i32_0 : i32, i32
  }
  func.func @transform_10(%arg0: i32) -> (i32, i32) {
    %c0_i32 = arith.constant 0 : i32
    %c0_i32_0 = arith.constant 0 : i32
    return %c0_i32, %arg0 : i32, i32
  }
}

</mosaic_0001>

<bundles_post_ra>
// kernel: tpu_custom_call.1
= control target key start
LH: loop header
LB: loop body
LE: loop exit
PB: predicated region body
PF: predicated region fallthrough
CT: control target
= control target key end

     0   :  { %s2044_s0 = inlined_call_operand.vmem [shape: f32[3], index: 0, kind: input, shape index: {}]   ;;  %s2045_s1 = inlined_call_operand.vmem [shape: f32[2,4096], index: 1, kind: input, shape index: {}]   ;;  %s2046_s2 = inlined_call_operand.vmem [shape: f32[32,2], index: 2, kind: input, shape index: {}]   ;;  %s2047_s3 = inlined_call_operand.vmem [shape: f32[32,1], index: 3, kind: input, shape index: {}]   ;;  %s2048_s4 = inlined_call_operand.vmem [shape: f32[32,32], index: 4, kind: input, shape index: {}]   ;;  %s2049_s5 = inlined_call_operand.vmem [shape: f32[32,1], index: 5, kind: input, shape index: {}]   ;;  %s2050_s6 = inlined_call_operand.vmem [shape: f32[32,32], index: 6, kind: input, shape index: {}]   ;;  %s2051_s7 = inlined_call_operand.vmem [shape: f32[32,1], index: 7, kind: input, shape index: {}]   ;;  %s2052_s8 = inlined_call_operand.vmem [shape: f32[32,1], index: 8, kind: input, shape index: {}]   ;;  %s2053_s9 = inlined_call_operand.<no memory space> [shape: f32[1,1], index: 9, kind: input, shape index: {}]   ;;  %s2054_s10 = inlined_call_operand.hbm [shape: f32[1,4096], index: 10, kind: output, shape index: {}]  }
   0x1   :  { %v15_v0 = vstv %s2053_s9 }
   0x2   :  { %16 = vst [vmem:[#allocation2] sm:$0x1] %v15_v0 }
   0x3   :  { %17 = vsyncpa [#allocation5], 0 }
   0x4   :  { %18 = vsyncpa [#allocation4], 0 }
   0x5   :  { %20 = vsyncpa [#allocation4 + $0x1], 0  ;;  %s1707_s15 = smov 0   ;;  %s1709_s16 = smov 0  }
   0x6   :  { %s1711_s17 = smov 0   ;;  %s1713_s18 = smov 0  }
   0x7 LB: > { %s1728_s9 = sadd.s32 4294967295, %s1640_s18   ;;  %s1370_s19 = sadd.s32 4294967294, %s1640_s18   ;;  %s1640_s18 = sphi %s1713_s18, %s2061_s18   ;;  %s1636_s17 = sphi %s1711_s17, %s2060_s17   ;;  %s1632_s16 = sphi %s1709_s16, %s2059_s16   ;;  %s1628_s15 = sphi %s1707_s15, %s2058_s15  }
   0x8   : > { %s1732_s20 = sadd.s32 1, %s1640_s18   ;;  %s248_s21 = sadd.s32 1, %s1636_s17 }
   0x9   : > { %s245_s22 = ssub.s32 %s1640_s18, %s1732_s20  ;;  %p258_p0 = scmp.ne.s32.totalorder %s1636_s17, %s1632_s16 }
   0xa   : > { %p246_p1 = scmp.eq.s32.totalorder %s245_s22, 0  ;;  %p259_p2 = scmp.eq.s32.totalorder %s1728_s9, 7 }
   0xb   : > { %p264_p3 = scmp.ne.s32.totalorder %s1632_s16, %s1628_s15  ;;  %p265_p4 = scmp.eq.s32.totalorder %s1370_s19, 7 }
   0xc   : > { %s1743_s23 = scalar_select %p246_p1, %s1636_s17, %s248_s21  }
   0xd   : > { %p1745_p5 = por %p259_p2, %p258_p0  ;;  %p1749_p6 = por %p265_p4, %p264_p3 }
   0xe   : > { %p1371_p7 = scmp.ge.s32.totalorder %s1640_s18, 1  ;;  %p272_p8 = scmp.lt.s32.totalorder %s1640_s18, 9 }
   0xf   : > { %p1417_p9 = scmp.eq.s32.totalorder %s1728_s9, 0  ;;  %s285_s29 = sshll.u32 %s2044_s0, 4  ;;  %s286_s29 = int_to_ptr.vmem [resolvable:$true] %s285_s29 }
  0x10   : > { %p1756_p10 = pnand %p1371_p7, %p272_p8  ;;  %s1561_s30 = scalar_lea.vmem %s286_s29, 16 }
  0x11   : > { %p1562_p13 = scmp.ne.s32.totalorder %s286_s29, %s1561_s30  ;;  %p1569_p3 = scmp.lt.s32.totalorder %s286_s29, %s286_s29 }
  0x12   : > { %p1409_p11 = pneg %p1756_p10  ;;  %p1570_p4 = scmp.lt.s32.totalorder %s1561_s30, %s1561_s30 }
  0x14   : > { %p1410_p12 = pnand %p1417_p9, %p1409_p11  ;;  %p1571_p7 = por %p1570_p4, %p1569_p3 }
  0x16   : > { %p1563_p0 = pneg %p1410_p12 }
  0x18   : > { %p1564_p1 = pnand %p1563_p0, %p1562_p13 }
  0x1a   : > { %p1565_p2 = pneg %p1564_p1 }
  0x1c   : > { %p1572_p8 = pnand %p1571_p7, %p1565_p2 }
  0x1e   : > { %1575 = shalt.err (!%p1572_p8)
}
  0x1f   : > { %s1642_s11 = smov [#allocation3]   ;;  %331 = sbr.rel (%p1756_p10) target bundleno = 712 (0x2c8), region = 60 }
  0x20   : > { %1412 = dma.vmem_to_smem (!%p1410_p12), %s286_s29, 16, %s1642_s11, [#allocation5]  }
  0x24   : > { %1619 = dma.done.wait (%p1417_p9), [#allocation5], 16  }
  0x25   : > { %1621 = vsyncadd (%p1417_p9), [#allocation5], 4294967280 }
  0x26   : > { %337 = sfence }
  0x27   : > { %v385_v1 = vld [vmem:[%s2047_s3 + $0x18] sm:$0xff]  ;;  %v1643_v3 = vmov 0   ;;  %v380_v4 = vld [vmem:[%s2046_s2 + $0x10] sm:$0xff]  ;;  %v1644_v5 = vmov 1   ;;  %v379_v6 = vld [vmem:[%s2046_s2 + $0x8] sm:$0xff]  ;;  %v1645_v17 = vmov 0.0   ;;  %v407_v25 = vlaneseq }
  0x28   : > { %v381_v2 = vld [vmem:[%s2046_s2 + $0x18] sm:$0xff]  ;;  %1459 = vset.pattern.permute.xlu1 %v1643_v3  ;;  %1458 = vset.pattern.permute.xlu0 %v1643_v3  ;;  %v384_v7 = vld [vmem:[%s2047_s3 + $0x10] sm:$0xff]  ;;  %v378_v8 = vld [vmem:[%s2046_s2] sm:$0xff]  ;;  %s1377_s21 = sshll.u32 %s1728_s9, 2  ;;  %s579_s29 = sld [smem:[#allocation3]]  ;;  %vm641_vm0 = vcmask 261120  }
  0x29   : > { %476 = vperm.xlu1 %1459, %v385_v1   ;;  %403 = vperm.xlu0 %1458, %v381_v2   ;;  %v383_v9 = vld [vmem:[%s2047_s3 + $0x8] sm:$0xff]  ;;  %v382_v10 = vld [vmem:[%s2047_s3] sm:$0xff]  ;;  %v620_v11 = vld [vmem:[%s2049_s5 + $0x18] sm:$0xff]  ;;  %p371_p9 = scmp.lt.s32.totalorder %s1377_s21, 31  ;;  %v1837_v26 = vshrl.u32 %v407_v25, 7  ;;  %s1387_s26 = sld [smem:[#allocation3 + $0x1]] }
  0x2a   : > { %v617_v12 = vld [vmem:[%s2049_s5] sm:$0xff]  ;;  %v618_v13 = vld [vmem:[%s2049_s5 + $0x8] sm:$0xff]  ;;  %v915_v15 = vld [vmem:[%s2051_s7 + $0x18] sm:$0xff]  ;;  %718 = vmatprep.mubr.f32.mxu0 %v1645_v17  ;;  %807 = vmatprep.mubr.f32.mxu1 %v1645_v17  ;;  %vm887_vm1 = vcmask 1041408   ;;  %s1396_s19 = sld [smem:[#allocation3 + $0x2]]  ;;  %vm1281_vm2 = vcmp.lt.s32.totalorder %v407_v25, 512 }
  0x2b   : > { %v913_v14 = vld [vmem:[%s2051_s7 + $0x8] sm:$0xff]  ;;  %v1163_v18 = vld [vmem:[%s2052_s8 + $0x18] sm:$0xff]  ;;  %v619_v19 = vld [vmem:[%s2049_s5 + $0x10] sm:$0xff]  ;;  %s2063_s21 = smov (!%p371_p9, %s1377_s21), 31  ;;  %v1843_v27 = vsub.s32 0, %v1837_v26  ;;  %v417_v28 = vsub.s32 4, %v1837_v26 }
  0x2c   : > { %v1161_v16 = vld [vmem:[%s2052_s8 + $0x8] sm:$0xff]  ;;  %v912_v20 = vld [vmem:[%s2051_s7] sm:$0xff]  ;;  %v914_v21 = vld [vmem:[%s2051_s7 + $0x10] sm:$0xff]  ;;  %s1378_s22 = sshll.u32 %s2063_s21, 1  ;;  %v413_v30 = vsub.s32 2, %v1837_v26  ;;  %v421_v31 = vsub.s32 6, %v1837_v26 }
  0x2d   : > { %1460 = vset.pattern.permute.xlu1 %v1644_v5  ;;  %398 = vperm.xlu0 %1458, %v380_v4   ;;  %v1160_v22 = vld [vmem:[%s2052_s8] sm:$0xff]  ;;  %v1162_v23 = vld [vmem:[%s2052_s8 + $0x10] sm:$0xff]  ;;  %s374_s28 = scalar_lea.vmem %s2045_s1, %s1378_s22  ;;  %v513_v34 = vsub.s32 1, %v1837_v26  ;;  %v517_v35 = vsub.s32 3, %v1837_v26  ;;  %v521_v36 = vsub.s32 5, %v1837_v26  ;;  %v525_v38 = vsub.s32 7, %v1837_v26 }
  0x2e   : > { %508 = vperm.xlu1 %1460, %v381_v2   ;;  %v1164_v24 = vld [vmem:[#allocation2] sm:$0x1]  ;;  %v1887_v2 = vstv %s579_s29  ;;  %s367_s21 = sand.u32 1, %s1632_s16   ;;  %s1648_s14 = smov [#allocation6]  }
  0x2f   : > { %v1846_v29 = vld [vmem:[%s374_s28] sm:$0xff]  ;;  %s1376_s22 = sshll.u32 %s367_s21, 2  ;;  %s1285_s12 = scalar_lea.sflag [#allocation4], %s367_s21 }
  0x30   : > { %v410_v32 = vrot.slane %v1846_v29, %v1843_v27  ;;  %v418_v33 = vrot.slane %v1846_v29, %v417_v28  ;;  %v414_v37 = vrot.slane %v1846_v29, %v413_v30  ;;  %v422_v39 = vrot.slane %v1846_v29, %v421_v31  ;;  %s369_s27 = scalar_lea.vmem [#allocation6], %s1376_s22 }
  0x31   : > { %393 = vperm.xlu0 %1458, %v379_v6   ;;  %v514_v42 = vrot.slane %v1846_v29, %v513_v34  ;;  %v518_v43 = vrot.slane %v1846_v29, %v517_v35  ;;  %v522_v44 = vrot.slane %v1846_v29, %v521_v36  ;;  %v526_v48 = vrot.slane %v1846_v29, %v525_v38  ;;  %s1299_s28 = sshll.u32 %s369_s27, 4  ;;  %s1300_s28 = int_to_ptr.vmem [resolvable:$true] %s1299_s28 }
  0x32   : > { %1461 = vset.pattern.permute.xlu1 %v1643_v3  ;;  %v430_v40 = vrot.slane %v410_v32, %v1843_v27  ;;  %v1861_v41 = vrot.slane %v418_v33, %v1843_v27  ;;  %v1867_v45 = vrot.slane %v414_v37, %v1843_v27  ;;  %v1871_v49 = vrot.slane %v422_v39, %v1843_v27  ;;  %s1576_s13 = scalar_lea.vmem %s1300_s28, 64 }
  0x33   : > { %471 = vperm.xlu1 %1461, %v384_v7   ;;  %v1874_v52 = vrot.slane %v514_v42, %v513_v34  ;;  %v1876_v53 = vrot.slane %v518_v43, %v513_v34  ;;  %v1878_v54 = vrot.slane %v522_v44, %v513_v34  ;;  %v1881_v57 = vrot.slane %v526_v48, %v513_v34  ;;  %p1577_p10 = scmp.ne.s32.totalorder %s1300_s28, %s1576_s13 }
  0x35   : > { %1462 = vset.pattern.permute.xlu0 %v1644_v5  ;;  %p1578_p11 = pnand %p1577_p10, %p1745_p5 }
  0x36   : > { %504 = vperm.xlu0 %1462, %v380_v4  }
  0x37   : > { %388 = vperm.xlu1 %1461, %v378_v8   ;;  %p1579_p12 = pneg %p1578_p11 }
  0x3a   : > { %500 = vperm.xlu0 %1462, %v379_v6  }
  0x3b   : > { %466 = vperm.xlu1 %1461, %v383_v9  }
  0x3e   : > { %496 = vperm.xlu0 %1462, %v378_v8  }
  0x3f   : > { %461 = vperm.xlu1 %1461, %v382_v10  }
  0x42   : > { %1463 = vset.pattern.permute.xlu0 %v1643_v3 }
  0x43   : > { %638 = vperm.xlu1 %1461, %v620_v11   ;;  %633 = vperm.xlu0 %1463, %v619_v19  }
  0x47   : > { %623 = vperm.xlu1 %1461, %v617_v12   ;;  %918 = vperm.xlu0 %1463, %v912_v20  }
  0x4b   : > { %628 = vperm.xlu1 %1461, %v618_v13   ;;  %928 = vperm.xlu0 %1463, %v914_v21  }
  0x4f   : > { %923 = vperm.xlu1 %1461, %v913_v14   ;;  %1167 = vperm.xlu0 %1463, %v1160_v22  }
  0x53   : > { %933 = vperm.xlu1 %1461, %v915_v15   ;;  %1177 = vperm.xlu0 %1463, %v1162_v23  }
  0x57   : > { %1172 = vperm.xlu1 %1461, %v1161_v16   ;;  %1239 = vperm.xlu0 %1463, %v1164_v24  }
  0x5b   : > { %1182 = vperm.xlu1 %1461, %v1163_v18  }
  0xa4   : > { %v477_v46 = vpop.permute.xlu1 %476  ;;  %v404_v47 = vpop.permute.xlu0 %403 }
  0xa5   : > { %v455_v50 = vmul.f32 %v430_v40, %v404_v47  ;;  %v457_v51 = vmul.f32 %v1861_v41, %v404_v47  ;;  %v456_v55 = vmul.f32 %v1867_v45, %v404_v47  ;;  %v458_v58 = vmul.f32 %v1871_v49, %v404_v47 }
  0xa7   : > { %v491_v59 = vadd.f32 %v477_v46, %v455_v50  ;;  %v493_v61 = vadd.f32 %v477_v46, %v457_v51  ;;  %v492_v1 = vadd.f32 %v477_v46, %v456_v55  ;;  %v494_v9 = vadd.f32 %v477_v46, %v458_v58 }
  0xa8   : > { %v399_v56 = vpop.permute.xlu0 %398 }
  0xa9   : > { %v509_v60 = vpop.permute.xlu1 %508  ;;  %v451_v10 = vmul.f32 %v430_v40, %v399_v56  ;;  %v452_v11 = vmul.f32 %v1867_v45, %v399_v56  ;;  %v453_v12 = vmul.f32 %v1861_v41, %v399_v56  ;;  %v454_v14 = vmul.f32 %v1871_v49, %v399_v56 }
  0xaa   : > { %v559_v62 = vmul.f32 %v1874_v52, %v509_v60  ;;  %v560_v63 = vmul.f32 %v1876_v53, %v509_v60  ;;  %v561_v0 = vmul.f32 %v1878_v54, %v509_v60  ;;  %v562_v3 = vmul.f32 %v1881_v57, %v509_v60 }
  0xac   : > { %v575_v4 = vadd.f32 %v559_v62, %v491_v59  ;;  %v577_v5 = vadd.f32 %v561_v0, %v493_v61  ;;  %v394_v6 = vpop.permute.xlu0 %393  ;;  %v576_v7 = vadd.f32 %v560_v63, %v492_v1  ;;  %v578_v16 = vadd.f32 %v562_v3, %v494_v9 }
  0xad   : > { %v447_v32 = vmul.f32 %v430_v40, %v394_v6  ;;  %v448_v33 = vmul.f32 %v1867_v45, %v394_v6  ;;  %v449_v38 = vmul.f32 %v1861_v41, %v394_v6  ;;  %v450_v39 = vmul.f32 %v1871_v49, %v394_v6 }
  0xae   : > { %v472_v8 = vpop.permute.xlu1 %471  ;;  %v593_v13 = vmul.f32 %v1887_v2, %v575_v4  ;;  %v595_v15 = vmul.f32 %v1887_v2, %v577_v5  ;;  %v594_v22 = vmul.f32 %v1887_v2, %v576_v7 }
  0xaf   : > { %v487_v18 = vadd.f32 %v472_v8, %v451_v10  ;;  %v488_v19 = vadd.f32 %v472_v8, %v452_v11  ;;  %v489_v20 = vadd.f32 %v472_v8, %v453_v12  ;;  %v490_v34 = vadd.f32 %v472_v8, %v454_v14 }
  0xb0   : > { %1465 = vtanh.f32 %v593_v13 }
  0xb1   : > { %v505_v21 = vpop.permute.xlu0 %504  ;;  %1467 = vtanh.f32 %v595_v15 }
  0xb2   : > { %v555_v23 = vmul.f32 %v1874_v52, %v505_v21  ;;  %v556_v24 = vmul.f32 %v1876_v53, %v505_v21  ;;  %v557_v28 = vmul.f32 %v1878_v54, %v505_v21  ;;  %v558_v30 = vmul.f32 %v1881_v57, %v505_v21  ;;  %v389_v31 = vpop.permute.xlu1 %388 }
  0xb3   : > { %v443_v42 = vmul.f32 %v430_v40, %v389_v31  ;;  %1469 = vtanh.f32 %v594_v22  ;;  %v444_v61 = vmul.f32 %v1867_v45, %v389_v31  ;;  %v445_v62 = vmul.f32 %v1861_v41, %v389_v31 }
  0xb4   : > { %v571_v35 = vadd.f32 %v555_v23, %v487_v18  ;;  %v572_v36 = vadd.f32 %v556_v24, %v488_v19  ;;  %v573_v37 = vadd.f32 %v557_v28, %v489_v20  ;;  %v574_v44 = vadd.f32 %v558_v30, %v490_v34 }
  0xb5   : > { %v501_v43 = vpop.permute.xlu0 %500  ;;  %v446_v3 = vmul.f32 %v1871_v49, %v389_v31 }
  0xb6   : > { %v589_v46 = vmul.f32 %v1887_v2, %v571_v35  ;;  %v590_v47 = vmul.f32 %v1887_v2, %v572_v36  ;;  %v591_v48 = vmul.f32 %v1887_v2, %v573_v37  ;;  %v467_v50 = vpop.permute.xlu1 %466  ;;  %v551_v51 = vmul.f32 %v1874_v52, %v501_v43 }
  0xb7   : > { %v552_v55 = vmul.f32 %v1876_v53, %v501_v43  ;;  %v553_v56 = vmul.f32 %v1878_v54, %v501_v43  ;;  %v554_v58 = vmul.f32 %v1881_v57, %v501_v43  ;;  %v483_v40 = vadd.f32 %v467_v50, %v447_v32 }
  0xb8   : > { %1471 = vtanh.f32 %v589_v46  ;;  %v484_v59 = vadd.f32 %v467_v50, %v448_v33  ;;  %v485_v60 = vadd.f32 %v467_v50, %v449_v38  ;;  %v486_v63 = vadd.f32 %v467_v50, %v450_v39  ;;  %v616_v50 = vld [vmem:[%s2048_s4 + $0x18] sm:$0xff] }
  0xb9   : > { %1473 = vtanh.f32 %v590_v47  ;;  %v497_v0 = vpop.permute.xlu0 %496  ;;  %v592_v1 = vmul.f32 %v1887_v2, %v574_v44  ;;  %v567_v4 = vadd.f32 %v551_v51, %v483_v40  ;;  %v614_v47 = vld [vmem:[%s2048_s4 + $0x8] sm:$0xff] }
  0xba   : > { %v568_v5 = vadd.f32 %v552_v55, %v484_v59  ;;  %v462_v6 = vpop.permute.xlu1 %461  ;;  %1475 = vtanh.f32 %v591_v48  ;;  %v570_v7 = vadd.f32 %v554_v58, %v486_v63  ;;  %v547_v8 = vmul.f32 %v1874_v52, %v497_v0  ;;  %v615_v48 = vld [vmem:[%s2048_s4 + $0x10] sm:$0xff] }
  0xbb   : > { %v548_v9 = vmul.f32 %v1876_v53, %v497_v0  ;;  %v569_v10 = vadd.f32 %v553_v56, %v485_v60  ;;  %v585_v45 = vmul.f32 %v1887_v2, %v567_v4  ;;  %v549_v11 = vmul.f32 %v1878_v54, %v497_v0 }
  0xbc   : > { %v586_v41 = vmul.f32 %v1887_v2, %v568_v5  ;;  %v588_v12 = vmul.f32 %v1887_v2, %v570_v7  ;;  %v550_v49 = vmul.f32 %v1881_v57, %v497_v0  ;;  %v479_v13 = vadd.f32 %v462_v6, %v443_v42  ;;  %v613_v42 = vld [vmem:[%s2048_s4] sm:$0xff] }
  0xbd   : > { %v480_v14 = vadd.f32 %v462_v6, %v444_v61  ;;  %1477 = vtanh.f32 %v585_v45  ;;  %v481_v15 = vadd.f32 %v462_v6, %v445_v62  ;;  %v482_v18 = vadd.f32 %v462_v6, %v446_v3  ;;  %v1466_v20 = vpop.eup %1465 }
  0xbe   : > { %v596_v52 = vmul.f32 %v1887_v2, %v578_v16  ;;  %1479 = vtanh.f32 %v586_v41  ;;  %v563_v53 = vadd.f32 %v547_v8, %v479_v13  ;;  %v1468_v23 = vpop.eup %1467  ;;  %v587_v54 = vmul.f32 %v1887_v2, %v569_v10  ;;  %v639_v51 = vpop.permute.xlu1 %638 }
  0xbf   : > { %v564_v19 = vadd.f32 %v548_v9, %v480_v14  ;;  %1481 = vtanh.f32 %v592_v1  ;;  %v565_v21 = vadd.f32 %v549_v11, %v481_v15  ;;  %v566_v22 = vadd.f32 %v550_v49, %v482_v18  ;;  %v634_v7 = vpop.permute.xlu0 %633 }
  0xc0   : > { %1483 = vtanh.f32 %v588_v12  ;;  %v581_v57 = vmul.f32 %v1887_v2, %v563_v53  ;;  %v1470_v28 = vpop.eup %1469  ;;  %v833_v61 = vstv %s1387_s26  ;;  %s1402_s26 = sshll.u32 %s1728_s9, 6  ;;  %s1580_s9 = sshll.u32 %s1648_s14, 4  ;;  %s1581_s9 = int_to_ptr.vmem [resolvable:$false] %s1580_s9 }
  0xc1   : > { %v582_v24 = vmul.f32 %v1887_v2, %v564_v19  ;;  %v584_v30 = vmul.f32 %v1887_v2, %v566_v22  ;;  %1485 = vtanh.f32 %v596_v52  ;;  %v583_v16 = vmul.f32 %v1887_v2, %v565_v21  ;;  %678 = vmatprep.subr.mxu0 %v1470_v28  ;;  %s1297_s11 = scalar_lea.hbm %s2054_s10, %s1402_s26  ;;  %p1583_p13 = scmp.lt.s32.totalorder %s1300_s28, %s1581_s9 }
  0xc2   : > { %1487 = vtanh.f32 %v581_v57  ;;  %679 = vmatpush1.msra.mxu0 %v1466_v20  ;;  %v624_v56 = vpop.permute.xlu1 %623 }
  0xc3   : > { %1489 = vtanh.f32 %v582_v24 }
  0xc4   : > { %1491 = vtanh.f32 %v587_v54 }
  0xc5   : > { %v1472_v31 = vpop.eup %1471  ;;  %1493 = vtanh.f32 %v584_v30 }
  0xc6   : > { %v1474_v32 = vpop.eup %1473  ;;  %1495 = vtanh.f32 %v583_v16  ;;  %v629_v1 = vpop.permute.xlu1 %628 }
  0xc7   : > { %680 = vmatprep.subr.mxu0 %v1474_v32  ;;  %v1476_v33 = vpop.eup %1475 }
  0xc8   : > { %681 = vmatpush1.msra.mxu0 %v1472_v31 }
  0xca   : > { %v1478_v34 = vpop.eup %1477 }
  0xcb   : > { %v1480_v35 = vpop.eup %1479 }
  0xcc   : > { %v1482_v36 = vpop.eup %1481  ;;  %682 = vmatprep.subr.mxu0 %v1480_v35 }
  0xcd   : > { %v1484_v37 = vpop.eup %1483  ;;  %683 = vmatpush1.msra.mxu0 %v1478_v34 }
  0xce   : > { %v1486_v38 = vpop.eup %1485 }
  0xcf   : > { %v1488_v2 = vpop.eup %1487  ;;  %767 = vmatprep.subr.mxu1 %v1486_v38 }
  0xd0   : > { %v1490_v39 = vpop.eup %1489  ;;  %768 = vmatpush1.msra.mxu1 %v1468_v23  ;;  %v1646_v23 = vmov 1983009808  }
  0xd1   : > { %v1492_v43 = vpop.eup %1491  ;;  %769 = vmatprep.subr.mxu1 %v1482_v36  ;;  %684 = vmatprep.subr.mxu0 %v1490_v39  ;;  %v868_v54 = vunpack.c.l.s4 %v1646_v23 }
  0xd2   : > { %v1494_v44 = vpop.eup %1493  ;;  %770 = vmatpush1.msra.mxu1 %v1476_v33  ;;  %685 = vmatpush1.msra.mxu0 %v1488_v2 }
  0xd3   : > { %v1496_v46 = vpop.eup %1495  ;;  %771 = vmatprep.subr.mxu1 %v1484_v37  ;;  %1379 = vmatmul.mubr.msk.f32.vlgmr.msra.gmra.mxu0 %vm641_vm0, %v613_v42  ;;  %v869_v37 = vunpack.c.0.s8 %v868_v54 }
  0xd4   : > { %772 = vmatpush1.msra.mxu1 %v1492_v43  ;;  %724 = vmatprep.mubr.f32.mxu0 %v1645_v17 }
  0xd5   : > { %773 = vmatprep.subr.mxu1 %v1494_v44 }
  0xd6   : > { %774 = vmatpush1.msra.mxu1 %v1496_v46  ;;  %v872_v46 = vsub.s32 %v869_v37, %v1837_v26 }
  0xd7   : > { %1383 = vmatmul.mubr.msk.f32.vlgmr.msra.gmra.mxu1 %vm641_vm0, %v613_v42  ;;  %1380 = vmatmul.mubr.msk.f32.gmra.mxu0 %vm641_vm0, %v614_v47 }
  0xd8   : > { %813 = vmatprep.mubr.f32.mxu1 %v1645_v17  ;;  %730 = vmatprep.mubr.f32.mxu0 %v1645_v17 }
  0xdb   : > { %1384 = vmatmul.mubr.msk.f32.gmra.mxu1 %vm641_vm0, %v614_v47  ;;  %1381 = vmatmul.mubr.msk.f32.gmra.mxu0 %vm641_vm0, %v615_v48 }
  0xdc   : > { %819 = vmatprep.mubr.f32.mxu1 %v1645_v17  ;;  %736 = vmatprep.mubr.f32.mxu0 %v1645_v17 }
  0xdf   : > { %1385 = vmatmul.mubr.msk.f32.gmra.mxu1 %vm641_vm0, %v615_v48  ;;  %1382 = vmatmul.mubr.msk.f32.gmra.mxu0 %vm641_vm0, %v616_v50 }
  0xe0   : > { %825 = vmatprep.mubr.f32.mxu1 %v1645_v17  ;;  %1012 = vmatprep.mubr.f32.mxu0 %v1645_v17 }
  0xe3   : > { %1386 = vmatmul.mubr.msk.f32.gmra.mxu1 %vm641_vm0, %v616_v50  ;;  %v866_v50 = vcombine.high %v1846_v29, %v1846_v29 }
  0xe4   : > { %1101 = vmatprep.mubr.f32.mxu1 %v1645_v17 }
 0x193   : > { %v720_v55 = vpop.f32.mrf.mxu0 }
 0x194   : > { %v721_v60 = vadd.f32 %v720_v55, %v624_v56  ;;  %v873_v55 = vrot.slane %v1846_v29, %v872_v46 }
 0x195   : > { %v722_v58 = vpop.f32.mrf.mxu0 }
 0x196   : > { %v723_v62 = vadd.f32 %v722_v58, %v624_v56  ;;  %v834_v8 = vmul.f32 %v833_v61, %v721_v60  ;;  %v888_v29 = vsel %vm887_vm1, %v873_v55, 0.0 }
 0x197   : > { %v809_v40 = vpop.f32.mrf.mxu1  ;;  %v726_v59 = vpop.f32.mrf.mxu0 }
 0x198   : > { %v810_v3 = vadd.f32 %v809_v40, %v624_v56  ;;  %v727_v4 = vadd.f32 %v726_v59, %v629_v1  ;;  %v835_v10 = vmul.f32 %v833_v61, %v723_v62  ;;  %1497 = vtanh.f32 %v834_v8 }
 0x199   : > { %v811_v63 = vpop.f32.mrf.mxu1  ;;  %v728_v0 = vpop.f32.mrf.mxu0  ;;  %v880_v59 = vrot.slane %v866_v50, %v872_v46  ;;  %v881_v62 = vcombine.high %v873_v55, %v873_v55 }
 0x19a   : > { %v812_v9 = vadd.f32 %v811_v63, %v624_v56  ;;  %v729_v45 = vadd.f32 %v728_v0, %v629_v1  ;;  %v836_v12 = vmul.f32 %v833_v61, %v810_v3  ;;  %v838_v13 = vmul.f32 %v833_v61, %v727_v4 }
 0x19b   : > { %v815_v5 = vpop.f32.mrf.mxu1  ;;  %v732_v6 = vpop.f32.mrf.mxu0  ;;  %1499 = vtanh.f32 %v835_v10  ;;  %v889_v4 = vsel %vm887_vm1, %v881_v62, 0.0 }
 0x19c   : > { %v733_v49 = vadd.f32 %v732_v6, %v634_v7  ;;  %v837_v18 = vmul.f32 %v833_v61, %v812_v9  ;;  %v839_v53 = vmul.f32 %v833_v61, %v729_v45  ;;  %1501 = vtanh.f32 %v836_v12 }
 0x19d   : > { %v817_v41 = vpop.f32.mrf.mxu1  ;;  %v734_v11 = vpop.f32.mrf.mxu0  ;;  %1503 = vtanh.f32 %v838_v13  ;;  %v816_v38 = vadd.f32 %v815_v5, %v629_v1 }
 0x19e   : > { %v735_v19 = vadd.f32 %v734_v11, %v634_v7  ;;  %v842_v22 = vmul.f32 %v833_v61, %v733_v49  ;;  %1505 = vtanh.f32 %v837_v18  ;;  %v818_v35 = vadd.f32 %v817_v41, %v629_v1  ;;  %v908_v11 = vld [vmem:[%s2050_s6] sm:$0xff]  ;;  %v910_v18 = vld [vmem:[%s2050_s6 + $0x10] sm:$0xff] }
 0x19f   : > { %v821_v14 = vpop.f32.mrf.mxu1  ;;  %v738_v15 = vpop.f32.mrf.mxu0  ;;  %1507 = vtanh.f32 %v839_v53  ;;  %v840_v47 = vmul.f32 %v833_v61, %v816_v38  ;;  %v882_v1 = vcombine.high %v880_v59, %v880_v59  ;;  %v890_v41 = vsel %vm887_vm1, %v880_v59, 0.0 }
 0x1a0   : > { %v739_v52 = vadd.f32 %v738_v15, %v639_v51  ;;  %v822_v31 = vadd.f32 %v821_v14, %v634_v7  ;;  %v843_v32 = vmul.f32 %v833_v61, %v735_v19  ;;  %1509 = vtanh.f32 %v842_v22  ;;  %v909_v15 = vld [vmem:[%s2050_s6 + $0x8] sm:$0xff]  ;;  %v919_v53 = vpop.permute.xlu0 %918 }
 0x1a1   : > { %v823_v20 = vpop.f32.mrf.mxu1  ;;  %v740_v21 = vpop.f32.mrf.mxu0  ;;  %v841_v44 = vmul.f32 %v833_v61, %v818_v35  ;;  %v891_v9 = vsel %vm887_vm1, %v882_v1, 0.0 }
 0x1a2   : > { %v741_v24 = vadd.f32 %v740_v21, %v639_v51  ;;  %v824_v28 = vadd.f32 %v823_v20, %v634_v7  ;;  %v846_v30 = vmul.f32 %v833_v61, %v739_v52  ;;  %v844_v43 = vmul.f32 %v833_v61, %v822_v31  ;;  %v911_v52 = vld [vmem:[%s2050_s6 + $0x18] sm:$0xff] }
 0x1a3   : > { %v827_v57 = vpop.f32.mrf.mxu1  ;;  %v1989_v20 = vstv %s1396_s19  ;;  %s1582_s19 = scalar_lea.vmem %s1581_s9, 128 }
 0x1a4   : > { %v828_v16 = vadd.f32 %v827_v57, %v639_v51  ;;  %v847_v33 = vmul.f32 %v833_v61, %v741_v24  ;;  %v845_v39 = vmul.f32 %v833_v61, %v824_v28  ;;  %v924_v24 = vpop.permute.xlu1 %923  ;;  %v929_v38 = vpop.permute.xlu0 %928  ;;  %p1584_p0 = scmp.lt.s32.totalorder %s1582_s19, %s1576_s13 }
 0x1a5   : > { %v829_v34 = vpop.f32.mrf.mxu1  ;;  %v1498_v48 = vpop.eup %1497 }
 0x1a6   : > { %v830_v36 = vadd.f32 %v829_v34, %v639_v51  ;;  %v848_v2 = vmul.f32 %v833_v61, %v828_v16  ;;  %1511 = vtanh.f32 %v847_v33  ;;  %v892_v45 = vadd.f32 %v1498_v48, %v888_v29  ;;  %p1585_p1 = por %p1584_p0, %p1583_p13 }
 0x1a7   : > { %1513 = vtanh.f32 %v846_v30 }
 0x1a8   : > { %v849_v42 = vmul.f32 %v833_v61, %v830_v36  ;;  %1515 = vtanh.f32 %v843_v32  ;;  %v1500_v51 = vpop.eup %1499  ;;  %p1586_p2 = pnand %p1585_p1, %p1579_p12 }
 0x1a9   : > { %v1502_v56 = vpop.eup %1501  ;;  %v893_v8 = vadd.f32 %v1500_v51, %v889_v4 }
 0x1aa   : > { %1517 = vtanh.f32 %v849_v42  ;;  %v1504_v58 = vpop.eup %1503  ;;  %v894_v14 = vadd.f32 %v1502_v56, %v890_v41 }
 0x1ab   : > { %1519 = vtanh.f32 %v848_v2  ;;  %v1506_v40 = vpop.eup %1505 }
 0x1ac   : > { %1521 = vtanh.f32 %v845_v39  ;;  %v1508_v60 = vpop.eup %1507  ;;  %v895_v13 = vadd.f32 %v1506_v40, %v891_v9 }
 0x1ad   : > { %1523 = vtanh.f32 %v844_v43  ;;  %v1510_v63 = vpop.eup %1509 }
 0x1ae   : > { %1525 = vtanh.f32 %v841_v44 }
 0x1af   : > { %1527 = vtanh.f32 %v840_v47 }
 0x1b3   : > { %v1512_v61 = vpop.eup %1511 }
 0x1b4   : > { %v1514_v0 = vpop.eup %1513  ;;  %972 = vmatprep.subr.mxu0 %v1512_v61 }
 0x1b5   : > { %v1516_v3 = vpop.eup %1515  ;;  %973 = vmatpush1.msra.mxu0 %v1514_v0 }
 0x1b6   : > { %974 = vmatprep.subr.mxu0 %v1516_v3 }
 0x1b7   : > { %v1518_v5 = vpop.eup %1517  ;;  %975 = vmatpush1.msra.mxu0 %v1510_v63 }
 0x1b8   : > { %v1520_v6 = vpop.eup %1519  ;;  %1061 = vmatprep.subr.mxu1 %v1518_v5  ;;  %976 = vmatprep.subr.mxu0 %v1508_v60 }
 0x1b9   : > { %v1522_v7 = vpop.eup %1521  ;;  %1062 = vmatpush1.msra.mxu1 %v1520_v6  ;;  %977 = vmatpush1.msra.mxu0 %v1504_v58  ;;  %v934_v58 = vpop.permute.xlu1 %933 }
 0x1ba   : > { %v1524_v10 = vpop.eup %1523  ;;  %1063 = vmatprep.subr.mxu1 %v1522_v7  ;;  %978 = vmatprep.subr.mxu0 %v893_v8 }
 0x1bb   : > { %v1526_v12 = vpop.eup %1525  ;;  %1064 = vmatpush1.msra.mxu1 %v1524_v10  ;;  %979 = vmatpush1.msra.mxu0 %v892_v45 }
 0x1bc   : > { %v1528_v49 = vpop.eup %1527  ;;  %1065 = vmatprep.subr.mxu1 %v1526_v12  ;;  %1388 = vmatmul.mubr.msk.f32.vlgmr.msra.gmra.mxu0 %vm641_vm0, %v908_v11  ;;  %v1168_v12 = vpop.permute.xlu0 %1167 }
 0x1bd   : > { %1066 = vmatpush1.msra.mxu1 %v1528_v49  ;;  %1018 = vmatprep.mubr.f32.mxu0 %v1645_v17 }
 0x1be   : > { %1067 = vmatprep.subr.mxu1 %v895_v13 }
 0x1bf   : > { %1068 = vmatpush1.msra.mxu1 %v894_v14 }
 0x1c0   : > { %1392 = vmatmul.mubr.msk.f32.vlgmr.msra.gmra.mxu1 %vm641_vm0, %v908_v11  ;;  %1389 = vmatmul.mubr.msk.f32.gmra.mxu0 %vm641_vm0, %v909_v15 }
 0x1c1   : > { %1107 = vmatprep.mubr.f32.mxu1 %v1645_v17  ;;  %1024 = vmatprep.mubr.f32.mxu0 %v1645_v17 }
 0x1c4   : > { %1393 = vmatmul.mubr.msk.f32.gmra.mxu1 %vm641_vm0, %v909_v15  ;;  %1390 = vmatmul.mubr.msk.f32.gmra.mxu0 %vm641_vm0, %v910_v18 }
 0x1c5   : > { %1113 = vmatprep.mubr.f32.mxu1 %v1645_v17  ;;  %1030 = vmatprep.mubr.f32.mxu0 %v1645_v17 }
 0x1c8   : > { %1394 = vmatmul.mubr.msk.f32.gmra.mxu1 %vm641_vm0, %v910_v18  ;;  %1391 = vmatmul.mubr.msk.f32.gmra.mxu0 %vm641_vm0, %v911_v52 }
 0x1c9   : > { %1119 = vmatprep.mubr.f32.mxu1 %v1645_v17 }
 0x1cc   : > { %1395 = vmatmul.mubr.msk.f32.gmra.mxu1 %vm641_vm0, %v911_v52  ;;  %v1173_v52 = vpop.permute.xlu1 %1172 }
 0x27c   : > { %v1014_v19 = vpop.f32.mrf.mxu0 }
 0x27d   : > { %v1015_v21 = vadd.f32 %v1014_v19, %v919_v53 }
 0x27e   : > { %v1016_v22 = vpop.f32.mrf.mxu0 }
 0x27f   : > { %v1128_v23 = vmul.f32 %v1989_v20, %v1015_v21  ;;  %v1017_v57 = vadd.f32 %v1016_v22, %v919_v53  ;;  %v1178_v22 = vpop.permute.xlu0 %1177 }
 0x280   : > { %v1103_v54 = vpop.f32.mrf.mxu1  ;;  %v1020_v30 = vpop.f32.mrf.mxu0 }
 0x281   : > { %v1104_v28 = vadd.f32 %v1103_v54, %v919_v53  ;;  %v1129_v17 = vmul.f32 %v1989_v20, %v1017_v57  ;;  %v1021_v31 = vadd.f32 %v1020_v30, %v924_v24  ;;  %1529 = vtanh.f32 %v1128_v23 }
 0x282   : > { %v1105_v16 = vpop.f32.mrf.mxu1  ;;  %v1022_v34 = vpop.f32.mrf.mxu0 }
 0x283   : > { %v1130_v32 = vmul.f32 %v1989_v20, %v1104_v28  ;;  %v1106_v33 = vadd.f32 %v1105_v16, %v919_v53  ;;  %1531 = vtanh.f32 %v1129_v17  ;;  %v1132_v35 = vmul.f32 %v1989_v20, %v1021_v31 }
 0x284   : > { %v1109_v36 = vpop.f32.mrf.mxu1  ;;  %v1023_v37 = vadd.f32 %v1022_v34, %v924_v24  ;;  %v1026_v42 = vpop.f32.mrf.mxu0 }
 0x285   : > { %1533 = vtanh.f32 %v1130_v32  ;;  %v1131_v2 = vmul.f32 %v1989_v20, %v1106_v33  ;;  %v1110_v39 = vadd.f32 %v1109_v36, %v924_v24  ;;  %v1027_v46 = vadd.f32 %v1026_v42, %v929_v38  ;;  %v1183_v33 = vpop.permute.xlu1 %1182 }
 0x286   : > { %1535 = vtanh.f32 %v1132_v35  ;;  %v1133_v43 = vmul.f32 %v1989_v20, %v1023_v37  ;;  %v1111_v44 = vpop.f32.mrf.mxu1  ;;  %v1028_v50 = vpop.f32.mrf.mxu0 }
 0x287   : > { %1537 = vtanh.f32 %v1131_v2  ;;  %v1134_v47 = vmul.f32 %v1989_v20, %v1110_v39  ;;  %v1112_v48 = vadd.f32 %v1111_v44, %v924_v24  ;;  %v1136_v51 = vmul.f32 %v1989_v20, %v1027_v46 }
 0x288   : > { %1539 = vtanh.f32 %v1133_v43  ;;  %v1115_v55 = vpop.f32.mrf.mxu1  ;;  %v1029_v56 = vadd.f32 %v1028_v50, %v929_v38  ;;  %v1032_v60 = vpop.f32.mrf.mxu0 }
 0x289   : > { %1541 = vtanh.f32 %v1134_v47  ;;  %v1135_v40 = vmul.f32 %v1989_v20, %v1112_v48  ;;  %v1116_v59 = vadd.f32 %v1115_v55, %v929_v38  ;;  %v1033_v61 = vadd.f32 %v1032_v60, %v934_v58 }
 0x28a   : > { %1543 = vtanh.f32 %v1136_v51  ;;  %v1137_v62 = vmul.f32 %v1989_v20, %v1029_v56  ;;  %v1117_v63 = vpop.f32.mrf.mxu1  ;;  %v1034_v3 = vpop.f32.mrf.mxu0 }
 0x28b   : > { %1545 = vtanh.f32 %v1135_v40  ;;  %v1138_v0 = vmul.f32 %v1989_v20, %v1116_v59  ;;  %v1118_v1 = vadd.f32 %v1117_v63, %v929_v38  ;;  %v1140_v4 = vmul.f32 %v1989_v20, %v1033_v61 }
 0x28c   : > { %1547 = vtanh.f32 %v1137_v62  ;;  %v1121_v5 = vpop.f32.mrf.mxu1  ;;  %v1035_v29 = vadd.f32 %v1034_v3, %v934_v58 }
 0x28d   : > { %1549 = vtanh.f32 %v1138_v0  ;;  %v1139_v6 = vmul.f32 %v1989_v20, %v1118_v1  ;;  %v1122_v7 = vadd.f32 %v1121_v5, %v934_v58 }
 0x28e   : > { %1551 = vtanh.f32 %v1140_v4  ;;  %v1141_v8 = vmul.f32 %v1989_v20, %v1035_v29  ;;  %v1123_v9 = vpop.f32.mrf.mxu1  ;;  %v1530_v41 = vpop.eup %1529 }
 0x28f   : > { %1553 = vtanh.f32 %v1139_v6  ;;  %v1142_v10 = vmul.f32 %v1989_v20, %v1122_v7  ;;  %v1124_v45 = vadd.f32 %v1123_v9, %v934_v58  ;;  %v1185_v54 = vmul.f32 %v1530_v41, %v1168_v12 }
 0x290   : > { %1555 = vtanh.f32 %v1141_v8  ;;  %v1532_v11 = vpop.eup %1531  ;;  %v1647_v41 = vmov 1966171168  }
 0x291   : > { %1557 = vtanh.f32 %v1142_v10  ;;  %v1143_v49 = vmul.f32 %v1989_v20, %v1124_v45  ;;  %v1186_v16 = vmul.f32 %v1532_v11, %v1168_v12  ;;  %v1257_v11 = vunpack.c.l.s4 %v1647_v41 }
 0x292   : > { %v1534_v13 = vpop.eup %1533 }
 0x293   : > { %v1536_v14 = vpop.eup %1535  ;;  %1559 = vtanh.f32 %v1143_v49  ;;  %v1187_v34 = vmul.f32 %v1534_v13, %v1168_v12  ;;  %v1240_v13 = vpop.permute.xlu0 %1239 }
 0x294   : > { %v1538_v15 = vpop.eup %1537  ;;  %v1189_v19 = vmul.f32 %v1536_v14, %v1173_v52 }
 0x295   : > { %v1540_v18 = vpop.eup %1539  ;;  %v1188_v43 = vmul.f32 %v1538_v15, %v1168_v12 }
 0x296   : > { %v1542_v53 = vpop.eup %1541  ;;  %v1190_v57 = vmul.f32 %v1540_v18, %v1173_v52  ;;  %v1201_v31 = vadd.f32 %v1189_v19, %v1185_v54 }
 0x297   : > { %v1544_v21 = vpop.eup %1543  ;;  %v1191_v30 = vmul.f32 %v1542_v53, %v1173_v52 }
 0x298   : > { %v1546_v23 = vpop.eup %1545  ;;  %v1193_v24 = vmul.f32 %v1544_v21, %v1178_v22  ;;  %v1210_v38 = vadd.f32 %v1190_v57, %v1186_v16  ;;  %v1258_v21 = vunpack.c.0.s8 %v1257_v11 }
 0x299   : > { %v1548_v28 = vpop.eup %1547  ;;  %v1192_v35 = vmul.f32 %v1546_v23, %v1173_v52  ;;  %v1219_v44 = vadd.f32 %v1191_v30, %v1187_v34 }
 0x29a   : > { %v1550_v17 = vpop.eup %1549  ;;  %v1194_v20 = vmul.f32 %v1548_v28, %v1178_v22  ;;  %v1202_v2 = vadd.f32 %v1201_v31, %v1193_v24 }
 0x29b   : > { %v1552_v32 = vpop.eup %1551  ;;  %v1195_v36 = vmul.f32 %v1550_v17, %v1178_v22  ;;  %v1228_v55 = vadd.f32 %v1192_v35, %v1188_v43  ;;  %v1261_v17 = vsub.s32 %v1258_v21, %v1837_v26 }
 0x29c   : > { %v1554_v37 = vpop.eup %1553  ;;  %v1197_v39 = vmul.f32 %v1552_v32, %v1183_v33  ;;  %v1211_v48 = vadd.f32 %v1210_v38, %v1194_v20 }
 0x29d   : > { %v1556_v42 = vpop.eup %1555  ;;  %v1196_v46 = vmul.f32 %v1554_v37, %v1178_v22  ;;  %v1220_v56 = vadd.f32 %v1219_v44, %v1195_v36  ;;  %v1245_v22 = vrot.slane %v1240_v13, %v1843_v27 }
 0x29e   : > { %v1558_v47 = vpop.eup %1557  ;;  %v1203_v50 = vadd.f32 %v1202_v2, %v1197_v39  ;;  %v1198_v51 = vmul.f32 %v1556_v42, %v1183_v33 }
 0x29f   : > { %v1199_v58 = vmul.f32 %v1558_v47, %v1183_v33  ;;  %v1229_v62 = vadd.f32 %v1228_v55, %v1196_v46 }
 0x2a0   : > { %v1560_v40 = vpop.eup %1559  ;;  %v1204_v59 = vrot.slane %v1203_v50, 4  ;;  %v1212_v60 = vadd.f32 %v1211_v48, %v1198_v51 }
 0x2a1   : > { %v1221_v63 = vadd.f32 %v1220_v56, %v1199_v58  ;;  %v1200_v61 = vmul.f32 %v1560_v40, %v1183_v33 }
 0x2a2   : > { %v1205_v0 = vadd.f32 %v1204_v59, %v1203_v50  ;;  %v1213_v1 = vrot.slane %v1212_v60, 4 }
 0x2a3   : > { %v1222_v3 = vrot.slane %v1221_v63, 4  ;;  %v1230_v4 = vadd.f32 %v1229_v62, %v1200_v61 }
 0x2a4   : > { %v1214_v5 = vadd.f32 %v1213_v1, %v1212_v60  ;;  %v1206_v29 = vrot.slane %v1205_v0, 2 }
 0x2a5   : > { %v1223_v6 = vadd.f32 %v1222_v3, %v1221_v63  ;;  %v1231_v7 = vrot.slane %v1230_v4, 4 }
 0x2a6   : > { %v1207_v8 = vadd.f32 %v1206_v29, %v1205_v0  ;;  %v1215_v9 = vrot.slane %v1214_v5, 2 }
 0x2a7   : > { %v1232_v10 = vadd.f32 %v1231_v7, %v1230_v4  ;;  %v1224_v45 = vrot.slane %v1223_v6, 2 }
 0x2a8   : > { %v1208_v12 = vrot.slane %v1207_v8, 1  ;;  %v1216_v49 = vadd.f32 %v1215_v9, %v1214_v5 }
 0x2a9   : > { %v1225_v14 = vadd.f32 %v1224_v45, %v1223_v6  ;;  %v1233_v15 = vrot.slane %v1232_v10, 2 }
 0x2aa   : > { %v1209_v18 = vadd.f32 %v1208_v12, %v1207_v8  ;;  %v1217_v52 = vrot.slane %v1216_v49, 1 }
 0x2ab   : > { %v1226_v53 = vrot.slane %v1225_v14, 1  ;;  %v1234_v19 = vadd.f32 %v1233_v15, %v1232_v10 }
 0x2ac   : > { %v1218_v23 = vadd.f32 %v1217_v52, %v1216_v49  ;;  %v1246_v24 = vadd.f32 %v1245_v22, %v1209_v18 }
 0x2ad   : > { %v1227_v54 = vadd.f32 %v1226_v53, %v1225_v14  ;;  %v1235_v57 = vrot.slane %v1234_v19, 1 }
 0x2ae   : > { %v1247_v28 = vadd.f32 %v1245_v22, %v1218_v23 }
 0x2af   : > { %v1236_v30 = vadd.f32 %v1235_v57, %v1234_v19  ;;  %v1248_v31 = vadd.f32 %v1245_v22, %v1227_v54 }
 0x2b0   : > { %v1254_v16 = vcombine.low %v1246_v24, %v1247_v28 }
 0x2b1   : > { %v1249_v20 = vadd.f32 %v1245_v22, %v1236_v30 }
 0x2b2   : > { %v1262_v33 = vrot.slane %v1254_v16, %v1261_v17 }
 0x2b3   : > { %v1255_v32 = vcombine.low %v1248_v31, %v1249_v20 }
 0x2b5   : > { %v1269_v34 = vrot.slane %v1255_v32, %v1261_v17 }
 0x2b7   : > { %v1270_v27 = vcombine.low %v1262_v33, %v1269_v34 }
 0x2b9   : > { %v1277_v35 = vrot.slane %v1270_v27, %v1261_v17 }
 0x2bb   : > { %1283 = vst.msk [vmem:[%s369_s27] sm:$0xf] %vm1281_vm2, %v1277_v35 }
 0x2bc   : > { %1589 = shalt.err (!%p1586_p2)
}
 0x2bd   : > { %s1590_s22 = scalar_lea.hbm %s1297_s11, 64  ;;  %s1594_s27 = scalar_lea.hbm %s2054_s10, 512 }
 0x2be   : > { %p1591_p3 = scmp.ne.s32.totalorder %s1297_s11, %s1590_s22  ;;  %p1595_p8 = scmp.lt.s32.totalorder %s1297_s11, %s2054_s10 }
 0x2bf   : > { %p1596_p9 = scmp.lt.s32.totalorder %s1594_s27, %s1590_s22 }
 0x2c0   : > { %p1592_p4 = pnand %p1591_p3, %p1745_p5 }
 0x2c1   : > { %p1597_p10 = por %p1596_p9, %p1595_p8 }
 0x2c2   : > { %p1593_p7 = pneg %p1592_p4 }
 0x2c4   : > { %p1598_p11 = pnand %p1597_p10, %p1593_p7 }
 0x2c6   : > { %1601 = shalt.err (!%p1598_p11)
}
 0x2c7   : > { %1407 = dma.vmem_to_hbm [thread:$0]  (%p1745_p5), %s1300_s28, 64, %s1297_s11, %s1285_s12  }
 0x2c8 PF: > { %p1419_p12 = scmp.ge.s32.totalorder %s1640_s18, 2  ;;  %s1311_s13 = sand.u32 1, %s1628_s15  }
 0x2c9   : > { %s1312_s14 = scalar_lea.sflag [#allocation4], %s1311_s13 }
 0x2ca   : > { %p1414_p13 = pnand %p1419_p12, %p1749_p6 }
 0x2cc   : > { %p1415_p0 = pneg %p1414_p13 }
 0x2ce   : > { %1623 = dma.done.wait (%p1415_p0), %s1312_s14, 64  }
 0x2cf   : > { %1625 = vsyncadd (%p1415_p0), %s1312_s14, 4294967232  ;;  %p23_p1 = scmp.ge.s32.totalorder %s1732_s20, 10   ;;  %s2058_s15 = smov %s1632_s16 }
 0x2d0   : > { %s2059_s16 = smov %s1636_s17  ;;  %s2060_s17 = smov %s1743_s23 }
 0x2d1   : > { %s2061_s18 = smov %s1732_s20  ;;  %25 = sbr.rel (!%p23_p1) target bundleno = 7 (0x7), region = 100 }
 0x2d6   :  { %1317 = vsyncpa [#allocation4], 1 }
 0x2d7   :  { %1319 = vsyncpa [#allocation4 + $0x1], 1 }
 0x2d8   :  { %1320 = vsyncpa [#allocation5], 1 }
 0x2d9   :  { %1322 = vsyncpa [#allocation5 + $0x1], 1 }

</bundles_post_ra>
